<compile_context>
chip_gen: v6e
topology: v6e:2x2x1
jax: 0.10.0
libtpu: 0.0.40
codegen_flags: <defaults>
</compile_context>

<pallas_src>
import math

import jax
import jax.numpy as jnp
from jax.experimental import pallas as pl
from jax.experimental.pallas import tpu as pltpu


_BLOCK_BUDGET_BYTES = 2 * 1024 * 1024  # per-block budget (x4 with dbl-buffered in/out)


def _p_block(P, per_p_bytes):
    """Largest divisor of P (capped) whose block stays within the VMEM budget."""
    cap = max(1, _BLOCK_BUDGET_BYTES // max(1, per_p_bytes))
    cap = min(cap, P, 1024)
    for d in range(cap, 0, -1):
        if P % d == 0:
            return d
    return 1


def _minor_swap(x):
    """(P, A, B) -> (P, B, A): batched 2-D transpose of the two minor dims."""
    P, A, B = x.shape
    pblk = _p_block(P, A * B * x.dtype.itemsize)
    # TODO(synk): tile A/B as well when a single (A, B) slab exceeds VMEM.

    def kernel(x_ref, o_ref):
        o_ref[...] = jnp.swapaxes(x_ref[...], -2, -1)

    return pl.pallas_call(
        kernel,
        out_shape=jax.ShapeDtypeStruct((P, B, A), x.dtype),
        grid=(P // pblk,),
        in_specs=[pl.BlockSpec((pblk, A, B), lambda i: (i, 0, 0))],
        out_specs=pl.BlockSpec((pblk, B, A), lambda i: (i, 0, 0)),
        compiler_params=pltpu.CompilerParams(
            dimension_semantics=("parallel",)),
    )(x)


def _major_lane_swap(x):
    """(P, A, M, B) -> (P, B, M, A): swap a major dim with the lane dim.

    Single HBM pass: one block per batch slab; inside the kernel a static loop
    over the untouched middle dim M performs batched (A, B) -> (B, A) XLU
    transposes.
    """
    P, A, M, B = x.shape
    pblk = _p_block(P, A * M * B * x.dtype.itemsize)

    def kernel(x_ref, o_ref):
        # TODO(synk): switch to lax.fori_loop for very large M to bound code size.
        for m in range(M):
            o_ref[:, :, m, :] = jnp.swapaxes(x_ref[:, :, m, :], -2, -1)

    return pl.pallas_call(
        kernel,
        out_shape=jax.ShapeDtypeStruct((P, B, M, A), x.dtype),
        grid=(P // pblk,),
        in_specs=[pl.BlockSpec((pblk, A, M, B), lambda i: (i, 0, 0, 0))],
        out_specs=pl.BlockSpec((pblk, B, M, A), lambda i: (i, 0, 0, 0)),
        compiler_params=pltpu.CompilerParams(
            dimension_semantics=("parallel",)),
    )(x)


def _major_sublane_swap(x):
    """(P, A, M, B, T) -> (P, B, M, A, T): swap a major dim with the sublane dim.

    The untouched trailing dim T stays the lane dim on both sides, so both the
    input and output HBM transfers are contiguous rectangles; the permutation
    happens in VMEM with strided (pblk, A, T) loads and contiguous stores.
    """
    P, A, M, B, T = x.shape
    pblk = _p_block(P, A * B * T * x.dtype.itemsize)

    def kernel(x_ref, o_ref):
        # TODO(synk): switch to lax.fori_loop for very large B to bound code size.
        for j in range(B):
            o_ref[:, j, 0, :, :] = x_ref[:, :, 0, j, :]

    return pl.pallas_call(
        kernel,
        out_shape=jax.ShapeDtypeStruct((P, B, M, A, T), x.dtype),
        grid=(P // pblk, M),
        in_specs=[pl.BlockSpec((pblk, A, 1, B, T), lambda i, m: (i, 0, m, 0, 0))],
        out_specs=pl.BlockSpec((pblk, B, 1, A, T), lambda i, m: (i, 0, m, 0, 0)),
        compiler_params=pltpu.CompilerParams(
            dimension_semantics=("parallel", "parallel")),
    )(x)


def pallas_transpose(x, dim0, dim1):
    """Pallas equivalent of torch.Tensor.transpose(dim0, dim1)."""
    nd = x.ndim
    if nd < 2:
        return x
    d0, d1 = dim0 % nd, dim1 % nd
    if d0 == d1:
        return x
    a, b = (d0, d1) if d0 < d1 else (d1, d0)

    out_shape = list(x.shape)
    out_shape[a], out_shape[b] = out_shape[b], out_shape[a]
    out_shape = tuple(out_shape)

    # Canonical merged dims: (P, A, M, B, T) -> (P, B, M, A, T).
    P = math.prod(x.shape[:a])
    A = x.shape[a]
    M = math.prod(x.shape[a + 1:b])
    B = x.shape[b]
    T = math.prod(x.shape[b + 1:])

    if A == 1 or B == 1:
        # Swapping with a singleton dim never moves data: free reshape.
        return x.reshape(out_shape)

    if T == 1:
        if M == 1:
            y = _minor_swap(x.reshape(P, A, B))                  # (P, B, A)
        else:
            y = _major_lane_swap(x.reshape(P, A, M, B))          # (P, B, M, A)
    else:
        y = _major_sublane_swap(x.reshape(P, A, M, B, T))        # (P, B, M, A, T)

    return y.reshape(out_shape)


class Transpose:
    """Drop-in analogue of the PyTorch Transpose module."""

    def __init__(self, dim0: int, dim1: int):
        self.dim0 = dim0
        self.dim1 = dim1

    def __call__(self, x):
        return pallas_transpose(x, self.dim0, self.dim1)


if __name__ == "__main__":
    key = jax.random.PRNGKey(0)
    x = jax.random.normal(key, (2, 4, 16, 16), jnp.float32)

    # Primary instance: Transpose(1, 2), e.g. (B, C, H, W) -> (B, H, C, W).
    mod = Transpose(1, 2)
    out = jax.block_until_ready(mod(x))
    ref = jnp.swapaxes(x, 1, 2)
    assert out.shape == ref.shape, out.shape
    assert bool(jnp.array_equal(out, ref))

    # Exercise every dispatch path: minor swap, major<->sublane, major<->lane,
    # negative dims, and the no-op case.
    for d0, d1 in [(2, 3), (0, 1), (-1, -2), (1, 3), (0, 3), (0, 2), (2, 2)]:
        got = jax.block_until_ready(pallas_transpose(x, d0, d1))
        want = jnp.swapaxes(x, d0, d1)
        assert got.shape == want.shape, (d0, d1, got.shape)
        assert bool(jnp.array_equal(got, want)), (d0, d1)

    # Dtype robustness (bf16, sub-32-bit packing path).
    xb = x.astype(jnp.bfloat16)
    got = jax.block_until_ready(pallas_transpose(xb, 1, 2))
    assert bool(jnp.array_equal(got, jnp.swapaxes(xb, 1, 2)))

    print("KERNEL_OK")
</pallas_src>

<mosaic_0001>
module attributes {stable_mosaic.version = 11 : i64} {
  func.func @kernel(%arg0: i32, %arg1: i32, %arg2: memref<2x4x1x16x16xf32, #tpu.memory_space<vmem>>, %arg3: memref<2x16x1x4x16xf32, #tpu.memory_space<vmem>>) attributes {dimension_semantics = [#tpu.dimension_semantics<parallel>, #tpu.dimension_semantics<parallel>], iteration_bounds = array<i64: 1, 1>, scalar_prefetch = 0 : i64, scratch_operands = 0 : i64, tpu.core_type = #tpu.core_type<tc>, window_params = [{transform_indices = @transform_0, window_bounds = array<i64: 2, 4, 1, 16, 16>}, {transform_indices = @transform_1, window_bounds = array<i64: 2, 16, 1, 4, 16>}]} {
    %c0 = arith.constant 0 : index
    %c0_0 = arith.constant 0 : index
    %c0_1 = arith.constant 0 : index
    %c0_2 = arith.constant 0 : index
    %c0_3 = arith.constant 0 : index
    %0 = vector.load %arg2[%c0, %c0_0, %c0_1, %c0_2, %c0_3] : memref<2x4x1x16x16xf32, #tpu.memory_space<vmem>>, vector<2x4x1x1x16xf32>
    %1 = vector.shape_cast %0 : vector<2x4x1x1x16xf32> to vector<2x4x16xf32>
    %c0_4 = arith.constant 0 : index
    %c0_5 = arith.constant 0 : index
    %c0_6 = arith.constant 0 : index
    %c0_7 = arith.constant 0 : index
    %c0_8 = arith.constant 0 : index
    %2 = vector.load %arg3[%c0_4, %c0_5, %c0_6, %c0_7, %c0_8] : memref<2x16x1x4x16xf32, #tpu.memory_space<vmem>>, vector<2x1x1x4x16xf32>
    %3 = vector.shape_cast %2 : vector<2x1x1x4x16xf32> to vector<2x4x16xf32>
    %4 = vector.shape_cast %1 : vector<2x4x16xf32> to vector<2x1x1x4x16xf32>
    tpu.vector_store %arg3[%c0_4, %c0_5, %c0_6, %c0_7, %c0_8], %4 {strides = array<i32>} : memref<2x16x1x4x16xf32, #tpu.memory_space<vmem>>, vector<2x1x1x4x16xf32>,
    %c0_9 = arith.constant 0 : index
    %c0_10 = arith.constant 0 : index
    %c0_11 = arith.constant 0 : index
    %c1 = arith.constant 1 : index
    %c0_12 = arith.constant 0 : index
    %5 = vector.load %arg2[%c0_9, %c0_10, %c0_11, %c1, %c0_12] : memref<2x4x1x16x16xf32, #tpu.memory_space<vmem>>, vector<2x4x1x1x16xf32>
    %6 = vector.shape_cast %5 : vector<2x4x1x1x16xf32> to vector<2x4x16xf32>
    %c0_13 = arith.constant 0 : index
    %c1_14 = arith.constant 1 : index
    %c0_15 = arith.constant 0 : index
    %c0_16 = arith.constant 0 : index
    %c0_17 = arith.constant 0 : index
    %7 = vector.load %arg3[%c0_13, %c1_14, %c0_15, %c0_16, %c0_17] : memref<2x16x1x4x16xf32, #tpu.memory_space<vmem>>, vector<2x1x1x4x16xf32>
    %8 = vector.shape_cast %7 : vector<2x1x1x4x16xf32> to vector<2x4x16xf32>
    %9 = vector.shape_cast %6 : vector<2x4x16xf32> to vector<2x1x1x4x16xf32>
    tpu.vector_store %arg3[%c0_13, %c1_14, %c0_15, %c0_16, %c0_17], %9 {strides = array<i32>} : memref<2x16x1x4x16xf32, #tpu.memory_space<vmem>>, vector<2x1x1x4x16xf32>,
    %c0_18 = arith.constant 0 : index
    %c0_19 = arith.constant 0 : index
    %c0_20 = arith.constant 0 : index
    %c2 = arith.constant 2 : index
    %c0_21 = arith.constant 0 : index
    %10 = vector.load %arg2[%c0_18, %c0_19, %c0_20, %c2, %c0_21] : memref<2x4x1x16x16xf32, #tpu.memory_space<vmem>>, vector<2x4x1x1x16xf32>
    %11 = vector.shape_cast %10 : vector<2x4x1x1x16xf32> to vector<2x4x16xf32>
    %c0_22 = arith.constant 0 : index
    %c2_23 = arith.constant 2 : index
    %c0_24 = arith.constant 0 : index
    %c0_25 = arith.constant 0 : index
    %c0_26 = arith.constant 0 : index
    %12 = vector.load %arg3[%c0_22, %c2_23, %c0_24, %c0_25, %c0_26] : memref<2x16x1x4x16xf32, #tpu.memory_space<vmem>>, vector<2x1x1x4x16xf32>
    %13 = vector.shape_cast %12 : vector<2x1x1x4x16xf32> to vector<2x4x16xf32>
    %14 = vector.shape_cast %11 : vector<2x4x16xf32> to vector<2x1x1x4x16xf32>
    tpu.vector_store %arg3[%c0_22, %c2_23, %c0_24, %c0_25, %c0_26], %14 {strides = array<i32>} : memref<2x16x1x4x16xf32, #tpu.memory_space<vmem>>, vector<2x1x1x4x16xf32>,
    %c0_27 = arith.constant 0 : index
    %c0_28 = arith.constant 0 : index
    %c0_29 = arith.constant 0 : index
    %c3 = arith.constant 3 : index
    %c0_30 = arith.constant 0 : index
    %15 = vector.load %arg2[%c0_27, %c0_28, %c0_29, %c3, %c0_30] : memref<2x4x1x16x16xf32, #tpu.memory_space<vmem>>, vector<2x4x1x1x16xf32>
    %16 = vector.shape_cast %15 : vector<2x4x1x1x16xf32> to vector<2x4x16xf32>
    %c0_31 = arith.constant 0 : index
    %c3_32 = arith.constant 3 : index
    %c0_33 = arith.constant 0 : index
    %c0_34 = arith.constant 0 : index
    %c0_35 = arith.constant 0 : index
    %17 = vector.load %arg3[%c0_31, %c3_32, %c0_33, %c0_34, %c0_35] : memref<2x16x1x4x16xf32, #tpu.memory_space<vmem>>, vector<2x1x1x4x16xf32>
    %18 = vector.shape_cast %17 : vector<2x1x1x4x16xf32> to vector<2x4x16xf32>
    %19 = vector.shape_cast %16 : vector<2x4x16xf32> to vector<2x1x1x4x16xf32>
    tpu.vector_store %arg3[%c0_31, %c3_32, %c0_33, %c0_34, %c0_35], %19 {strides = array<i32>} : memref<2x16x1x4x16xf32, #tpu.memory_space<vmem>>, vector<2x1x1x4x16xf32>,
    %c0_36 = arith.constant 0 : index
    %c0_37 = arith.constant 0 : index
    %c0_38 = arith.constant 0 : index
    %c4 = arith.constant 4 : index
    %c0_39 = arith.constant 0 : index
    %20 = vector.load %arg2[%c0_36, %c0_37, %c0_38, %c4, %c0_39] : memref<2x4x1x16x16xf32, #tpu.memory_space<vmem>>, vector<2x4x1x1x16xf32>
    %21 = vector.shape_cast %20 : vector<2x4x1x1x16xf32> to vector<2x4x16xf32>
    %c0_40 = arith.constant 0 : index
    %c4_41 = arith.constant 4 : index
    %c0_42 = arith.constant 0 : index
    %c0_43 = arith.constant 0 : index
    %c0_44 = arith.constant 0 : index
    %22 = vector.load %arg3[%c0_40, %c4_41, %c0_42, %c0_43, %c0_44] : memref<2x16x1x4x16xf32, #tpu.memory_space<vmem>>, vector<2x1x1x4x16xf32>
    %23 = vector.shape_cast %22 : vector<2x1x1x4x16xf32> to vector<2x4x16xf32>
    %24 = vector.shape_cast %21 : vector<2x4x16xf32> to vector<2x1x1x4x16xf32>
    tpu.vector_store %arg3[%c0_40, %c4_41, %c0_42, %c0_43, %c0_44], %24 {strides = array<i32>} : memref<2x16x1x4x16xf32, #tpu.memory_space<vmem>>, vector<2x1x1x4x16xf32>,
    %c0_45 = arith.constant 0 : index
    %c0_46 = arith.constant 0 : index
    %c0_47 = arith.constant 0 : index
    %c5 = arith.constant 5 : index
    %c0_48 = arith.constant 0 : index
    %25 = vector.load %arg2[%c0_45, %c0_46, %c0_47, %c5, %c0_48] : memref<2x4x1x16x16xf32, #tpu.memory_space<vmem>>, vector<2x4x1x1x16xf32>
    %26 = vector.shape_cast %25 : vector<2x4x1x1x16xf32> to vector<2x4x16xf32>
    %c0_49 = arith.constant 0 : index
    %c5_50 = arith.constant 5 : index
    %c0_51 = arith.constant 0 : index
    %c0_52 = arith.constant 0 : index
    %c0_53 = arith.constant 0 : index
    %27 = vector.load %arg3[%c0_49, %c5_50, %c0_51, %c0_52, %c0_53] : memref<2x16x1x4x16xf32, #tpu.memory_space<vmem>>, vector<2x1x1x4x16xf32>
    %28 = vector.shape_cast %27 : vector<2x1x1x4x16xf32> to vector<2x4x16xf32>
    %29 = vector.shape_cast %26 : vector<2x4x16xf32> to vector<2x1x1x4x16xf32>
    tpu.vector_store %arg3[%c0_49, %c5_50, %c0_51, %c0_52, %c0_53], %29 {strides = array<i32>} : memref<2x16x1x4x16xf32, #tpu.memory_space<vmem>>, vector<2x1x1x4x16xf32>,
    %c0_54 = arith.constant 0 : index
    %c0_55 = arith.constant 0 : index
    %c0_56 = arith.constant 0 : index
    %c6 = arith.constant 6 : index
    %c0_57 = arith.constant 0 : index
    %30 = vector.load %arg2[%c0_54, %c0_55, %c0_56, %c6, %c0_57] : memref<2x4x1x16x16xf32, #tpu.memory_space<vmem>>, vector<2x4x1x1x16xf32>
    %31 = vector.shape_cast %30 : vector<2x4x1x1x16xf32> to vector<2x4x16xf32>
    %c0_58 = arith.constant 0 : index
    %c6_59 = arith.constant 6 : index
    %c0_60 = arith.constant 0 : index
    %c0_61 = arith.constant 0 : index
    %c0_62 = arith.constant 0 : index
    %32 = vector.load %arg3[%c0_58, %c6_59, %c0_60, %c0_61, %c0_62] : memref<2x16x1x4x16xf32, #tpu.memory_space<vmem>>, vector<2x1x1x4x16xf32>
    %33 = vector.shape_cast %32 : vector<2x1x1x4x16xf32> to vector<2x4x16xf32>
    %34 = vector.shape_cast %31 : vector<2x4x16xf32> to vector<2x1x1x4x16xf32>
    tpu.vector_store %arg3[%c0_58, %c6_59, %c0_60, %c0_61, %c0_62], %34 {strides = array<i32>} : memref<2x16x1x4x16xf32, #tpu.memory_space<vmem>>, vector<2x1x1x4x16xf32>,
    %c0_63 = arith.constant 0 : index
    %c0_64 = arith.constant 0 : index
    %c0_65 = arith.constant 0 : index
    %c7 = arith.constant 7 : index
    %c0_66 = arith.constant 0 : index
    %35 = vector.load %arg2[%c0_63, %c0_64, %c0_65, %c7, %c0_66] : memref<2x4x1x16x16xf32, #tpu.memory_space<vmem>>, vector<2x4x1x1x16xf32>
    %36 = vector.shape_cast %35 : vector<2x4x1x1x16xf32> to vector<2x4x16xf32>
    %c0_67 = arith.constant 0 : index
    %c7_68 = arith.constant 7 : index
    %c0_69 = arith.constant 0 : index
    %c0_70 = arith.constant 0 : index
    %c0_71 = arith.constant 0 : index
    %37 = vector.load %arg3[%c0_67, %c7_68, %c0_69, %c0_70, %c0_71] : memref<2x16x1x4x16xf32, #tpu.memory_space<vmem>>, vector<2x1x1x4x16xf32>
    %38 = vector.shape_cast %37 : vector<2x1x1x4x16xf32> to vector<2x4x16xf32>
    %39 = vector.shape_cast %36 : vector<2x4x16xf32> to vector<2x1x1x4x16xf32>
    tpu.vector_store %arg3[%c0_67, %c7_68, %c0_69, %c0_70, %c0_71], %39 {strides = array<i32>} : memref<2x16x1x4x16xf32, #tpu.memory_space<vmem>>, vector<2x1x1x4x16xf32>,
    %c0_72 = arith.constant 0 : index
    %c0_73 = arith.constant 0 : index
    %c0_74 = arith.constant 0 : index
    %c8 = arith.constant 8 : index
    %c0_75 = arith.constant 0 : index
    %40 = vector.load %arg2[%c0_72, %c0_73, %c0_74, %c8, %c0_75] : memref<2x4x1x16x16xf32, #tpu.memory_space<vmem>>, vector<2x4x1x1x16xf32>
    %41 = vector.shape_cast %40 : vector<2x4x1x1x16xf32> to vector<2x4x16xf32>
    %c0_76 = arith.constant 0 : index
    %c8_77 = arith.constant 8 : index
    %c0_78 = arith.constant 0 : index
    %c0_79 = arith.constant 0 : index
    %c0_80 = arith.constant 0 : index
    %42 = vector.load %arg3[%c0_76, %c8_77, %c0_78, %c0_79, %c0_80] : memref<2x16x1x4x16xf32, #tpu.memory_space<vmem>>, vector<2x1x1x4x16xf32>
    %43 = vector.shape_cast %42 : vector<2x1x1x4x16xf32> to vector<2x4x16xf32>
    %44 = vector.shape_cast %41 : vector<2x4x16xf32> to vector<2x1x1x4x16xf32>
    tpu.vector_store %arg3[%c0_76, %c8_77, %c0_78, %c0_79, %c0_80], %44 {strides = array<i32>} : memref<2x16x1x4x16xf32, #tpu.memory_space<vmem>>, vector<2x1x1x4x16xf32>,
    %c0_81 = arith.constant 0 : index
    %c0_82 = arith.constant 0 : index
    %c0_83 = arith.constant 0 : index
    %c9 = arith.constant 9 : index
    %c0_84 = arith.constant 0 : index
    %45 = vector.load %arg2[%c0_81, %c0_82, %c0_83, %c9, %c0_84] : memref<2x4x1x16x16xf32, #tpu.memory_space<vmem>>, vector<2x4x1x1x16xf32>
    %46 = vector.shape_cast %45 : vector<2x4x1x1x16xf32> to vector<2x4x16xf32>
    %c0_85 = arith.constant 0 : index
    %c9_86 = arith.constant 9 : index
    %c0_87 = arith.constant 0 : index
    %c0_88 = arith.constant 0 : index
    %c0_89 = arith.constant 0 : index
    %47 = vector.load %arg3[%c0_85, %c9_86, %c0_87, %c0_88, %c0_89] : memref<2x16x1x4x16xf32, #tpu.memory_space<vmem>>, vector<2x1x1x4x16xf32>
    %48 = vector.shape_cast %47 : vector<2x1x1x4x16xf32> to vector<2x4x16xf32>
    %49 = vector.shape_cast %46 : vector<2x4x16xf32> to vector<2x1x1x4x16xf32>
    tpu.vector_store %arg3[%c0_85, %c9_86, %c0_87, %c0_88, %c0_89], %49 {strides = array<i32>} : memref<2x16x1x4x16xf32, #tpu.memory_space<vmem>>, vector<2x1x1x4x16xf32>,
    %c0_90 = arith.constant 0 : index
    %c0_91 = arith.constant 0 : index
    %c0_92 = arith.constant 0 : index
    %c10 = arith.constant 10 : index
    %c0_93 = arith.constant 0 : index
    %50 = vector.load %arg2[%c0_90, %c0_91, %c0_92, %c10, %c0_93] : memref<2x4x1x16x16xf32, #tpu.memory_space<vmem>>, vector<2x4x1x1x16xf32>
    %51 = vector.shape_cast %50 : vector<2x4x1x1x16xf32> to vector<2x4x16xf32>
    %c0_94 = arith.constant 0 : index
    %c10_95 = arith.constant 10 : index
    %c0_96 = arith.constant 0 : index
    %c0_97 = arith.constant 0 : index
    %c0_98 = arith.constant 0 : index
    %52 = vector.load %arg3[%c0_94, %c10_95, %c0_96, %c0_97, %c0_98] : memref<2x16x1x4x16xf32, #tpu.memory_space<vmem>>, vector<2x1x1x4x16xf32>
    %53 = vector.shape_cast %52 : vector<2x1x1x4x16xf32> to vector<2x4x16xf32>
    %54 = vector.shape_cast %51 : vector<2x4x16xf32> to vector<2x1x1x4x16xf32>
    tpu.vector_store %arg3[%c0_94, %c10_95, %c0_96, %c0_97, %c0_98], %54 {strides = array<i32>} : memref<2x16x1x4x16xf32, #tpu.memory_space<vmem>>, vector<2x1x1x4x16xf32>,
    %c0_99 = arith.constant 0 : index
    %c0_100 = arith.constant 0 : index
    %c0_101 = arith.constant 0 : index
    %c11 = arith.constant 11 : index
    %c0_102 = arith.constant 0 : index
    %55 = vector.load %arg2[%c0_99, %c0_100, %c0_101, %c11, %c0_102] : memref<2x4x1x16x16xf32, #tpu.memory_space<vmem>>, vector<2x4x1x1x16xf32>
    %56 = vector.shape_cast %55 : vector<2x4x1x1x16xf32> to vector<2x4x16xf32>
    %c0_103 = arith.constant 0 : index
    %c11_104 = arith.constant 11 : index
    %c0_105 = arith.constant 0 : index
    %c0_106 = arith.constant 0 : index
    %c0_107 = arith.constant 0 : index
    %57 = vector.load %arg3[%c0_103, %c11_104, %c0_105, %c0_106, %c0_107] : memref<2x16x1x4x16xf32, #tpu.memory_space<vmem>>, vector<2x1x1x4x16xf32>
    %58 = vector.shape_cast %57 : vector<2x1x1x4x16xf32> to vector<2x4x16xf32>
    %59 = vector.shape_cast %56 : vector<2x4x16xf32> to vector<2x1x1x4x16xf32>
    tpu.vector_store %arg3[%c0_103, %c11_104, %c0_105, %c0_106, %c0_107], %59 {strides = array<i32>} : memref<2x16x1x4x16xf32, #tpu.memory_space<vmem>>, vector<2x1x1x4x16xf32>,
    %c0_108 = arith.constant 0 : index
    %c0_109 = arith.constant 0 : index
    %c0_110 = arith.constant 0 : index
    %c12 = arith.constant 12 : index
    %c0_111 = arith.constant 0 : index
    %60 = vector.load %arg2[%c0_108, %c0_109, %c0_110, %c12, %c0_111] : memref<2x4x1x16x16xf32, #tpu.memory_space<vmem>>, vector<2x4x1x1x16xf32>
    %61 = vector.shape_cast %60 : vector<2x4x1x1x16xf32> to vector<2x4x16xf32>
    %c0_112 = arith.constant 0 : index
    %c12_113 = arith.constant 12 : index
    %c0_114 = arith.constant 0 : index
    %c0_115 = arith.constant 0 : index
    %c0_116 = arith.constant 0 : index
    %62 = vector.load %arg3[%c0_112, %c12_113, %c0_114, %c0_115, %c0_116] : memref<2x16x1x4x16xf32, #tpu.memory_space<vmem>>, vector<2x1x1x4x16xf32>
    %63 = vector.shape_cast %62 : vector<2x1x1x4x16xf32> to vector<2x4x16xf32>
    %64 = vector.shape_cast %61 : vector<2x4x16xf32> to vector<2x1x1x4x16xf32>
    tpu.vector_store %arg3[%c0_112, %c12_113, %c0_114, %c0_115, %c0_116], %64 {strides = array<i32>} : memref<2x16x1x4x16xf32, #tpu.memory_space<vmem>>, vector<2x1x1x4x16xf32>,
    %c0_117 = arith.constant 0 : index
    %c0_118 = arith.constant 0 : index
    %c0_119 = arith.constant 0 : index
    %c13 = arith.constant 13 : index
    %c0_120 = arith.constant 0 : index
    %65 = vector.load %arg2[%c0_117, %c0_118, %c0_119, %c13, %c0_120] : memref<2x4x1x16x16xf32, #tpu.memory_space<vmem>>, vector<2x4x1x1x16xf32>
    %66 = vector.shape_cast %65 : vector<2x4x1x1x16xf32> to vector<2x4x16xf32>
    %c0_121 = arith.constant 0 : index
    %c13_122 = arith.constant 13 : index
    %c0_123 = arith.constant 0 : index
    %c0_124 = arith.constant 0 : index
    %c0_125 = arith.constant 0 : index
    %67 = vector.load %arg3[%c0_121, %c13_122, %c0_123, %c0_124, %c0_125] : memref<2x16x1x4x16xf32, #tpu.memory_space<vmem>>, vector<2x1x1x4x16xf32>
    %68 = vector.shape_cast %67 : vector<2x1x1x4x16xf32> to vector<2x4x16xf32>
    %69 = vector.shape_cast %66 : vector<2x4x16xf32> to vector<2x1x1x4x16xf32>
    tpu.vector_store %arg3[%c0_121, %c13_122, %c0_123, %c0_124, %c0_125], %69 {strides = array<i32>} : memref<2x16x1x4x16xf32, #tpu.memory_space<vmem>>, vector<2x1x1x4x16xf32>,
    %c0_126 = arith.constant 0 : index
    %c0_127 = arith.constant 0 : index
    %c0_128 = arith.constant 0 : index
    %c14 = arith.constant 14 : index
    %c0_129 = arith.constant 0 : index
    %70 = vector.load %arg2[%c0_126, %c0_127, %c0_128, %c14, %c0_129] : memref<2x4x1x16x16xf32, #tpu.memory_space<vmem>>, vector<2x4x1x1x16xf32>
    %71 = vector.shape_cast %70 : vector<2x4x1x1x16xf32> to vector<2x4x16xf32>
    %c0_130 = arith.constant 0 : index
    %c14_131 = arith.constant 14 : index
    %c0_132 = arith.constant 0 : index
    %c0_133 = arith.constant 0 : index
    %c0_134 = arith.constant 0 : index
    %72 = vector.load %arg3[%c0_130, %c14_131, %c0_132, %c0_133, %c0_134] : memref<2x16x1x4x16xf32, #tpu.memory_space<vmem>>, vector<2x1x1x4x16xf32>
    %73 = vector.shape_cast %72 : vector<2x1x1x4x16xf32> to vector<2x4x16xf32>
    %74 = vector.shape_cast %71 : vector<2x4x16xf32> to vector<2x1x1x4x16xf32>
    tpu.vector_store %arg3[%c0_130, %c14_131, %c0_132, %c0_133, %c0_134], %74 {strides = array<i32>} : memref<2x16x1x4x16xf32, #tpu.memory_space<vmem>>, vector<2x1x1x4x16xf32>,
    %c0_135 = arith.constant 0 : index
    %c0_136 = arith.constant 0 : index
    %c0_137 = arith.constant 0 : index
    %c15 = arith.constant 15 : index
    %c0_138 = arith.constant 0 : index
    %75 = vector.load %arg2[%c0_135, %c0_136, %c0_137, %c15, %c0_138] : memref<2x4x1x16x16xf32, #tpu.memory_space<vmem>>, vector<2x4x1x1x16xf32>
    %76 = vector.shape_cast %75 : vector<2x4x1x1x16xf32> to vector<2x4x16xf32>
    %c0_139 = arith.constant 0 : index
    %c15_140 = arith.constant 15 : index
    %c0_141 = arith.constant 0 : index
    %c0_142 = arith.constant 0 : index
    %c0_143 = arith.constant 0 : index
    %77 = vector.load %arg3[%c0_139, %c15_140, %c0_141, %c0_142, %c0_143] : memref<2x16x1x4x16xf32, #tpu.memory_space<vmem>>, vector<2x1x1x4x16xf32>
    %78 = vector.shape_cast %77 : vector<2x1x1x4x16xf32> to vector<2x4x16xf32>
    %79 = vector.shape_cast %76 : vector<2x4x16xf32> to vector<2x1x1x4x16xf32>
    tpu.vector_store %arg3[%c0_139, %c15_140, %c0_141, %c0_142, %c0_143], %79 {strides = array<i32>} : memref<2x16x1x4x16xf32, #tpu.memory_space<vmem>>, vector<2x1x1x4x16xf32>,
    return
  }
  func.func @transform_0(%arg0: i32, %arg1: i32) -> (i32, i32, i32, i32, i32) {
    %c0_i32 = arith.constant 0 : i32
    %c0_i32_0 = arith.constant 0 : i32
    %c0_i32_1 = arith.constant 0 : i32
    %c0_i32_2 = arith.constant 0 : i32
    return %arg0, %c0_i32, %arg1, %c0_i32_0, %c0_i32_1 : i32, i32, i32, i32, i32
  }
  func.func @transform_1(%arg0: i32, %arg1: i32) -> (i32, i32, i32, i32, i32) {
    %c0_i32 = arith.constant 0 : i32
    %c0_i32_0 = arith.constant 0 : i32
    %c0_i32_1 = arith.constant 0 : i32
    %c0_i32_2 = arith.constant 0 : i32
    return %arg0, %c0_i32, %arg1, %c0_i32_0, %c0_i32_1 : i32, i32, i32, i32, i32
  }
}

</mosaic_0001>

<bundles_post_ra>
// kernel: tpu_custom_call.1
= control target key start
LH: loop header
LB: loop body
LE: loop exit
PB: predicated region body
PF: predicated region fallthrough
CT: control target
= control target key end

     0   :  { %6 = vsyncpa [#allocation3], 0  ;;  %s771_s0 = inlined_call_operand.hbm [shape: f32[2,4,1,16,16], index: 0, kind: input, shape index: {}]   ;;  %s772_s1 = inlined_call_operand.hbm [shape: f32[2,16,1,4,16], index: 1, kind: output, shape index: {}]  }
   0x1   :  { %7 = vsyncpa [#allocation4], 0  ;;  %s621_s6 = smov [#allocation2]  }
   0x2   :  { %s13_s7 = sshll.u32 %s621_s6, 4  ;;  %s14_s7 = int_to_ptr.vmem [resolvable:$true] %s13_s7 }
   0x3   :  { %s585_s8 = scalar_lea.vmem %s14_s7, 2048  ;;  %p590_p1 = scmp.lt.s32.totalorder %s14_s7, %s14_s7 }
   0x4   :  { %p586_p0 = scmp.ne.s32.totalorder %s14_s7, %s585_s8  ;;  %p591_p2 = scmp.lt.s32.totalorder %s585_s8, %s585_s8 }
   0x6   :  { %p592_p3 = por %p591_p2, %p590_p1 }
   0x8   :  { %p593_p4 = pnand %p592_p3, %p586_p0 }
   0xa   :  { %596 = shalt.err (!%p593_p4)
}
   0xb   :  { %s622_s9 = smov 128   ;;  %s623_s10 = smov 8  }
   0xc   :  { %19 = dma.hbm_to_vmem [thread:$0]  %s771_s0, 2048, %s14_s7, [#allocation3], %s622_s9, %s622_s9, %s623_s10  }
   0xd   :  { %617 = dma.done.wait [#allocation3], 2048  }
   0xe   :  { %618 = vsyncadd [#allocation3], 4294965248  ;;  %vm40_vm0 = vcmask 1041409   ;;  %vm43_vm1 = vcmask 1042434   ;;  %vm46_vm2 = vcmask 1043459   ;;  %vm56_vm3 = vcmask 125952  }
   0xf   :  { %v23_v0 = vld [vmem:[#allocation2] sm:$0x1]  ;;  %v24_v1 = vld [vmem:[#allocation2 + $0x10] sm:$0x1]  ;;  %v59_v14 = vld [vmem:[#allocation2 + $0x1] sm:$0x1] }
  0x10   :  { %v25_v2 = vld [vmem:[#allocation2 + $0x20] sm:$0x1]  ;;  %v26_v3 = vld [vmem:[#allocation2 + $0x30] sm:$0x1]  ;;  %v39_v4 = vrot.slane %v24_v1, 7  ;;  %s624_s0 = smov [#allocation5]  }
  0x11   :  { %v42_v5 = vrot.slane %v25_v2, 6  ;;  %v27_v6 = vld [vmem:[#allocation2 + $0x40] sm:$0x1]  ;;  %v45_v7 = vrot.slane %v26_v3, 5  ;;  %v28_v8 = vld [vmem:[#allocation2 + $0x50] sm:$0x1] }
  0x12   :  { %v29_v9 = vld [vmem:[#allocation2 + $0x60] sm:$0x1]  ;;  %v41_v10 = vsel %vm40_vm0, %v39_v4, %v23_v0  ;;  %v30_v11 = vld [vmem:[#allocation2 + $0x70] sm:$0x1]  ;;  %v48_v12 = vrot.slane %v28_v8, 7  ;;  %s559_s13 = sshll.u32 %s624_s0, 4  ;;  %s560_s13 = int_to_ptr.vmem [resolvable:$true] %s559_s13 }
  0x13   :  { %v50_v13 = vrot.slane %v29_v9, 6  ;;  %v44_v15 = vsel %vm43_vm1, %v42_v5, %v41_v10  ;;  %v52_v16 = vrot.slane %v30_v11, 5  ;;  %v60_v17 = vld [vmem:[#allocation2 + $0x11] sm:$0x1]  ;;  %v61_v18 = vld [vmem:[#allocation2 + $0x21] sm:$0x1]  ;;  %p602_p6 = scmp.lt.s32.totalorder %s560_s13, %s560_s13 }
  0x14   :  { %v47_v19 = vsel %vm46_vm2, %v45_v7, %v44_v15  ;;  %v49_v20 = vsel %vm40_vm0, %v48_v12, %v27_v6  ;;  %v62_v21 = vld [vmem:[#allocation2 + $0x31] sm:$0x1]  ;;  %v75_v22 = vrot.slane %v60_v17, 7  ;;  %v77_v23 = vrot.slane %v61_v18, 6  ;;  %v63_v24 = vld [vmem:[#allocation2 + $0x41] sm:$0x1] }
  0x15   :  { %57 = vst.msk [vmem:[#allocation5] sm:$0xf] %vm56_vm3, %v47_v19  ;;  %v51_v25 = vsel %vm43_vm1, %v50_v13, %v49_v20  ;;  %v79_v26 = vrot.slane %v62_v21, 5  ;;  %v64_v27 = vld [vmem:[#allocation2 + $0x51] sm:$0x1]  ;;  %s597_s14 = scalar_lea.vmem %s560_s13, 2048 }
  0x16   :  { %v65_v28 = vld [vmem:[#allocation2 + $0x61] sm:$0x1]  ;;  %v53_v29 = vsel %vm46_vm2, %v52_v16, %v51_v25  ;;  %v76_v30 = vsel %vm40_vm0, %v75_v22, %v59_v14  ;;  %v66_v31 = vld [vmem:[#allocation2 + $0x71] sm:$0x1]  ;;  %v81_v32 = vrot.slane %v64_v27, 7  ;;  %p598_p5 = scmp.ne.s32.totalorder %s560_s13, %s597_s14  ;;  %p603_p7 = scmp.lt.s32.totalorder %s597_s14, %s597_s14 }
  0x17   :  { %v83_v33 = vrot.slane %v65_v28, 6  ;;  %v92_v34 = vld [vmem:[#allocation2 + $0x2] sm:$0x1]  ;;  %58 = vst.msk [vmem:[#allocation5 + $0x40] sm:$0xf] %vm56_vm3, %v53_v29  ;;  %v78_v35 = vsel %vm43_vm1, %v77_v23, %v76_v30  ;;  %v85_v36 = vrot.slane %v66_v31, 5 }
  0x18   :  { %v93_v37 = vld [vmem:[#allocation2 + $0x12] sm:$0x1]  ;;  %v94_v38 = vld [vmem:[#allocation2 + $0x22] sm:$0x1]  ;;  %v80_v39 = vsel %vm46_vm2, %v79_v26, %v78_v35  ;;  %v82_v40 = vsel %vm40_vm0, %v81_v32, %v63_v24  ;;  %v125_v54 = vld [vmem:[#allocation2 + $0x3] sm:$0x1]  ;;  %p604_p8 = por %p603_p7, %p602_p6 }
  0x19   :  { %v95_v41 = vld [vmem:[#allocation2 + $0x32] sm:$0x1]  ;;  %v108_v42 = vrot.slane %v93_v37, 7  ;;  %v110_v43 = vrot.slane %v94_v38, 6  ;;  %v96_v44 = vld [vmem:[#allocation2 + $0x42] sm:$0x1]  ;;  %v84_v45 = vsel %vm43_vm1, %v83_v33, %v82_v40 }
  0x1a   :  { %90 = vst.msk [vmem:[#allocation5 + $0x4] sm:$0xf] %vm56_vm3, %v80_v39  ;;  %v112_v46 = vrot.slane %v95_v41, 5  ;;  %v97_v47 = vld [vmem:[#allocation2 + $0x52] sm:$0x1]  ;;  %v86_v49 = vsel %vm46_vm2, %v85_v36, %v84_v45  ;;  %p605_p9 = pnand %p604_p8, %p598_p5 }
  0x1b   :  { %v98_v48 = vld [vmem:[#allocation2 + $0x62] sm:$0x1]  ;;  %v109_v50 = vsel %vm40_vm0, %v108_v42, %v92_v34  ;;  %v99_v51 = vld [vmem:[#allocation2 + $0x72] sm:$0x1]  ;;  %v114_v52 = vrot.slane %v97_v47, 7 }
  0x1c   :  { %v116_v53 = vrot.slane %v98_v48, 6  ;;  %91 = vst.msk [vmem:[#allocation5 + $0x44] sm:$0xf] %vm56_vm3, %v86_v49  ;;  %v111_v55 = vsel %vm43_vm1, %v110_v43, %v109_v50  ;;  %v118_v56 = vrot.slane %v99_v51, 5  ;;  %v126_v57 = vld [vmem:[#allocation2 + $0x13] sm:$0x1] }
  0x1d   :  { %v127_v58 = vld [vmem:[#allocation2 + $0x23] sm:$0x1]  ;;  %v113_v59 = vsel %vm46_vm2, %v112_v46, %v111_v55  ;;  %v115_v60 = vsel %vm40_vm0, %v114_v52, %v96_v44  ;;  %v128_v61 = vld [vmem:[#allocation2 + $0x33] sm:$0x1]  ;;  %v141_v62 = vrot.slane %v126_v57, 7 }
  0x1e   :  { %v143_v63 = vrot.slane %v127_v58, 6  ;;  %v129_v0 = vld [vmem:[#allocation2 + $0x43] sm:$0x1]  ;;  %123 = vst.msk [vmem:[#allocation5 + $0x8] sm:$0xf] %vm56_vm3, %v113_v59  ;;  %v117_v1 = vsel %vm43_vm1, %v116_v53, %v115_v60  ;;  %v145_v2 = vrot.slane %v128_v61, 5 }
  0x1f   :  { %v130_v3 = vld [vmem:[#allocation2 + $0x53] sm:$0x1]  ;;  %v131_v4 = vld [vmem:[#allocation2 + $0x63] sm:$0x1]  ;;  %v119_v5 = vsel %vm46_vm2, %v118_v56, %v117_v1  ;;  %v142_v6 = vsel %vm40_vm0, %v141_v62, %v125_v54  ;;  %v158_v10 = vld [vmem:[#allocation2 + $0x4] sm:$0x1] }
  0x20   :  { %v132_v7 = vld [vmem:[#allocation2 + $0x73] sm:$0x1]  ;;  %v147_v8 = vrot.slane %v130_v3, 7  ;;  %v149_v9 = vrot.slane %v131_v4, 6  ;;  %124 = vst.msk [vmem:[#allocation5 + $0x48] sm:$0xf] %vm56_vm3, %v119_v5  ;;  %v144_v11 = vsel %vm43_vm1, %v143_v63, %v142_v6 }
  0x21   :  { %v151_v12 = vrot.slane %v132_v7, 5  ;;  %v159_v13 = vld [vmem:[#allocation2 + $0x14] sm:$0x1]  ;;  %v160_v14 = vld [vmem:[#allocation2 + $0x24] sm:$0x1]  ;;  %v146_v15 = vsel %vm46_vm2, %v145_v2, %v144_v11 }
  0x22   :  { %v148_v16 = vsel %vm40_vm0, %v147_v8, %v129_v0  ;;  %v161_v17 = vld [vmem:[#allocation2 + $0x34] sm:$0x1]  ;;  %v174_v18 = vrot.slane %v159_v13, 7  ;;  %v176_v19 = vrot.slane %v160_v14, 6  ;;  %v162_v20 = vld [vmem:[#allocation2 + $0x44] sm:$0x1] }
  0x23   :  { %156 = vst.msk [vmem:[#allocation5 + $0xc] sm:$0xf] %vm56_vm3, %v146_v15  ;;  %v150_v21 = vsel %vm43_vm1, %v149_v9, %v148_v16  ;;  %v178_v22 = vrot.slane %v161_v17, 5  ;;  %v163_v23 = vld [vmem:[#allocation2 + $0x54] sm:$0x1] }
  0x24   :  { %v164_v24 = vld [vmem:[#allocation2 + $0x64] sm:$0x1]  ;;  %v152_v25 = vsel %vm46_vm2, %v151_v12, %v150_v21  ;;  %v175_v26 = vsel %vm40_vm0, %v174_v18, %v158_v10  ;;  %v165_v27 = vld [vmem:[#allocation2 + $0x74] sm:$0x1]  ;;  %v180_v28 = vrot.slane %v163_v23, 7 }
  0x25   :  { %v182_v29 = vrot.slane %v164_v24, 6  ;;  %v191_v30 = vld [vmem:[#allocation2 + $0x5] sm:$0x1]  ;;  %157 = vst.msk [vmem:[#allocation5 + $0x4c] sm:$0xf] %vm56_vm3, %v152_v25  ;;  %v177_v31 = vsel %vm43_vm1, %v176_v19, %v175_v26  ;;  %v184_v32 = vrot.slane %v165_v27, 5 }
  0x26   :  { %v192_v33 = vld [vmem:[#allocation2 + $0x15] sm:$0x1]  ;;  %v193_v34 = vld [vmem:[#allocation2 + $0x25] sm:$0x1]  ;;  %v179_v35 = vsel %vm46_vm2, %v178_v22, %v177_v31  ;;  %v181_v36 = vsel %vm40_vm0, %v180_v28, %v162_v20  ;;  %v224_v50 = vld [vmem:[#allocation2 + $0x6] sm:$0x1] }
  0x27   :  { %v194_v37 = vld [vmem:[#allocation2 + $0x35] sm:$0x1]  ;;  %v207_v38 = vrot.slane %v192_v33, 7  ;;  %v209_v39 = vrot.slane %v193_v34, 6  ;;  %v195_v40 = vld [vmem:[#allocation2 + $0x45] sm:$0x1]  ;;  %v183_v41 = vsel %vm43_vm1, %v182_v29, %v181_v36 }
  0x28   :  { %189 = vst.msk [vmem:[#allocation5 + $0x10] sm:$0xf] %vm56_vm3, %v179_v35  ;;  %v211_v42 = vrot.slane %v194_v37, 5  ;;  %v196_v43 = vld [vmem:[#allocation2 + $0x55] sm:$0x1]  ;;  %v185_v45 = vsel %vm46_vm2, %v184_v32, %v183_v41 }
  0x29   :  { %v197_v44 = vld [vmem:[#allocation2 + $0x65] sm:$0x1]  ;;  %v208_v46 = vsel %vm40_vm0, %v207_v38, %v191_v30  ;;  %v198_v47 = vld [vmem:[#allocation2 + $0x75] sm:$0x1]  ;;  %v213_v48 = vrot.slane %v196_v43, 7 }
  0x2a   :  { %v215_v49 = vrot.slane %v197_v44, 6  ;;  %190 = vst.msk [vmem:[#allocation5 + $0x50] sm:$0xf] %vm56_vm3, %v185_v45  ;;  %v210_v51 = vsel %vm43_vm1, %v209_v39, %v208_v46  ;;  %v217_v52 = vrot.slane %v198_v47, 5  ;;  %v225_v53 = vld [vmem:[#allocation2 + $0x16] sm:$0x1] }
  0x2b   :  { %v226_v54 = vld [vmem:[#allocation2 + $0x26] sm:$0x1]  ;;  %v212_v55 = vsel %vm46_vm2, %v211_v42, %v210_v51  ;;  %v214_v56 = vsel %vm40_vm0, %v213_v48, %v195_v40  ;;  %v227_v57 = vld [vmem:[#allocation2 + $0x36] sm:$0x1]  ;;  %v240_v58 = vrot.slane %v225_v53, 7 }
  0x2c   :  { %v242_v59 = vrot.slane %v226_v54, 6  ;;  %v228_v60 = vld [vmem:[#allocation2 + $0x46] sm:$0x1]  ;;  %222 = vst.msk [vmem:[#allocation5 + $0x14] sm:$0xf] %vm56_vm3, %v212_v55  ;;  %v216_v61 = vsel %vm43_vm1, %v215_v49, %v214_v56  ;;  %v244_v62 = vrot.slane %v227_v57, 5 }
  0x2d   :  { %v229_v63 = vld [vmem:[#allocation2 + $0x56] sm:$0x1]  ;;  %v230_v0 = vld [vmem:[#allocation2 + $0x66] sm:$0x1]  ;;  %v218_v1 = vsel %vm46_vm2, %v217_v52, %v216_v61  ;;  %v241_v2 = vsel %vm40_vm0, %v240_v58, %v224_v50  ;;  %v257_v6 = vld [vmem:[#allocation2 + $0x7] sm:$0x1] }
  0x2e   :  { %v231_v3 = vld [vmem:[#allocation2 + $0x76] sm:$0x1]  ;;  %v246_v4 = vrot.slane %v229_v63, 7  ;;  %v248_v5 = vrot.slane %v230_v0, 6  ;;  %223 = vst.msk [vmem:[#allocation5 + $0x54] sm:$0xf] %vm56_vm3, %v218_v1  ;;  %v243_v7 = vsel %vm43_vm1, %v242_v59, %v241_v2 }
  0x2f   :  { %v250_v8 = vrot.slane %v231_v3, 5  ;;  %v258_v9 = vld [vmem:[#allocation2 + $0x17] sm:$0x1]  ;;  %v259_v10 = vld [vmem:[#allocation2 + $0x27] sm:$0x1]  ;;  %v245_v11 = vsel %vm46_vm2, %v244_v62, %v243_v7 }
  0x30   :  { %v247_v12 = vsel %vm40_vm0, %v246_v4, %v228_v60  ;;  %v260_v13 = vld [vmem:[#allocation2 + $0x37] sm:$0x1]  ;;  %v273_v14 = vrot.slane %v258_v9, 7  ;;  %v275_v15 = vrot.slane %v259_v10, 6  ;;  %v261_v16 = vld [vmem:[#allocation2 + $0x47] sm:$0x1] }
  0x31   :  { %255 = vst.msk [vmem:[#allocation5 + $0x18] sm:$0xf] %vm56_vm3, %v245_v11  ;;  %v249_v17 = vsel %vm43_vm1, %v248_v5, %v247_v12  ;;  %v277_v18 = vrot.slane %v260_v13, 5  ;;  %v262_v19 = vld [vmem:[#allocation2 + $0x57] sm:$0x1] }
  0x32   :  { %v263_v20 = vld [vmem:[#allocation2 + $0x67] sm:$0x1]  ;;  %v251_v21 = vsel %vm46_vm2, %v250_v8, %v249_v17  ;;  %v274_v22 = vsel %vm40_vm0, %v273_v14, %v257_v6  ;;  %v264_v23 = vld [vmem:[#allocation2 + $0x77] sm:$0x1]  ;;  %v279_v24 = vrot.slane %v262_v19, 7 }
  0x33   :  { %v281_v25 = vrot.slane %v263_v20, 6  ;;  %v290_v26 = vld [vmem:[#allocation2 + $0x8] sm:$0x1]  ;;  %256 = vst.msk [vmem:[#allocation5 + $0x58] sm:$0xf] %vm56_vm3, %v251_v21  ;;  %v276_v27 = vsel %vm43_vm1, %v275_v15, %v274_v22  ;;  %v283_v28 = vrot.slane %v264_v23, 5 }
  0x34   :  { %v291_v29 = vld [vmem:[#allocation2 + $0x18] sm:$0x1]  ;;  %v292_v30 = vld [vmem:[#allocation2 + $0x28] sm:$0x1]  ;;  %v278_v31 = vsel %vm46_vm2, %v277_v18, %v276_v27  ;;  %v280_v32 = vsel %vm40_vm0, %v279_v24, %v261_v16  ;;  %v323_v46 = vld [vmem:[#allocation2 + $0x9] sm:$0x1] }
  0x35   :  { %v293_v33 = vld [vmem:[#allocation2 + $0x38] sm:$0x1]  ;;  %v306_v34 = vrot.slane %v291_v29, 7  ;;  %v308_v35 = vrot.slane %v292_v30, 6  ;;  %v294_v36 = vld [vmem:[#allocation2 + $0x48] sm:$0x1]  ;;  %v282_v37 = vsel %vm43_vm1, %v281_v25, %v280_v32 }
  0x36   :  { %288 = vst.msk [vmem:[#allocation5 + $0x1c] sm:$0xf] %vm56_vm3, %v278_v31  ;;  %v310_v38 = vrot.slane %v293_v33, 5  ;;  %v295_v39 = vld [vmem:[#allocation2 + $0x58] sm:$0x1]  ;;  %v284_v41 = vsel %vm46_vm2, %v283_v28, %v282_v37 }
  0x37   :  { %v296_v40 = vld [vmem:[#allocation2 + $0x68] sm:$0x1]  ;;  %v307_v42 = vsel %vm40_vm0, %v306_v34, %v290_v26  ;;  %v297_v43 = vld [vmem:[#allocation2 + $0x78] sm:$0x1]  ;;  %v312_v44 = vrot.slane %v295_v39, 7 }
  0x38   :  { %v314_v45 = vrot.slane %v296_v40, 6  ;;  %289 = vst.msk [vmem:[#allocation5 + $0x5c] sm:$0xf] %vm56_vm3, %v284_v41  ;;  %v309_v47 = vsel %vm43_vm1, %v308_v35, %v307_v42  ;;  %v316_v48 = vrot.slane %v297_v43, 5  ;;  %v324_v49 = vld [vmem:[#allocation2 + $0x19] sm:$0x1] }
  0x39   :  { %v325_v50 = vld [vmem:[#allocation2 + $0x29] sm:$0x1]  ;;  %v311_v51 = vsel %vm46_vm2, %v310_v38, %v309_v47  ;;  %v313_v52 = vsel %vm40_vm0, %v312_v44, %v294_v36  ;;  %v326_v53 = vld [vmem:[#allocation2 + $0x39] sm:$0x1]  ;;  %v339_v54 = vrot.slane %v324_v49, 7 }
  0x3a   :  { %v341_v55 = vrot.slane %v325_v50, 6  ;;  %v327_v56 = vld [vmem:[#allocation2 + $0x49] sm:$0x1]  ;;  %321 = vst.msk [vmem:[#allocation5 + $0x20] sm:$0xf] %vm56_vm3, %v311_v51  ;;  %v315_v57 = vsel %vm43_vm1, %v314_v45, %v313_v52  ;;  %v343_v58 = vrot.slane %v326_v53, 5 }
  0x3b   :  { %v328_v59 = vld [vmem:[#allocation2 + $0x59] sm:$0x1]  ;;  %v329_v60 = vld [vmem:[#allocation2 + $0x69] sm:$0x1]  ;;  %v317_v61 = vsel %vm46_vm2, %v316_v48, %v315_v57  ;;  %v340_v62 = vsel %vm40_vm0, %v339_v54, %v323_v46  ;;  %v356_v2 = vld [vmem:[#allocation2 + $0xa] sm:$0x1] }
  0x3c   :  { %v330_v63 = vld [vmem:[#allocation2 + $0x79] sm:$0x1]  ;;  %v345_v0 = vrot.slane %v328_v59, 7  ;;  %v347_v1 = vrot.slane %v329_v60, 6  ;;  %322 = vst.msk [vmem:[#allocation5 + $0x60] sm:$0xf] %vm56_vm3, %v317_v61  ;;  %v342_v3 = vsel %vm43_vm1, %v341_v55, %v340_v62 }
  0x3d   :  { %v349_v4 = vrot.slane %v330_v63, 5  ;;  %v357_v5 = vld [vmem:[#allocation2 + $0x1a] sm:$0x1]  ;;  %v358_v6 = vld [vmem:[#allocation2 + $0x2a] sm:$0x1]  ;;  %v344_v7 = vsel %vm46_vm2, %v343_v58, %v342_v3 }
  0x3e   :  { %v346_v8 = vsel %vm40_vm0, %v345_v0, %v327_v56  ;;  %v359_v9 = vld [vmem:[#allocation2 + $0x3a] sm:$0x1]  ;;  %v372_v10 = vrot.slane %v357_v5, 7  ;;  %v374_v11 = vrot.slane %v358_v6, 6  ;;  %v360_v12 = vld [vmem:[#allocation2 + $0x4a] sm:$0x1] }
  0x3f   :  { %354 = vst.msk [vmem:[#allocation5 + $0x24] sm:$0xf] %vm56_vm3, %v344_v7  ;;  %v348_v13 = vsel %vm43_vm1, %v347_v1, %v346_v8  ;;  %v376_v14 = vrot.slane %v359_v9, 5  ;;  %v361_v15 = vld [vmem:[#allocation2 + $0x5a] sm:$0x1] }
  0x40   :  { %v362_v16 = vld [vmem:[#allocation2 + $0x6a] sm:$0x1]  ;;  %v350_v17 = vsel %vm46_vm2, %v349_v4, %v348_v13  ;;  %v373_v18 = vsel %vm40_vm0, %v372_v10, %v356_v2  ;;  %v363_v19 = vld [vmem:[#allocation2 + $0x7a] sm:$0x1]  ;;  %v378_v20 = vrot.slane %v361_v15, 7 }
  0x41   :  { %v380_v21 = vrot.slane %v362_v16, 6  ;;  %v389_v22 = vld [vmem:[#allocation2 + $0xb] sm:$0x1]  ;;  %355 = vst.msk [vmem:[#allocation5 + $0x64] sm:$0xf] %vm56_vm3, %v350_v17  ;;  %v375_v23 = vsel %vm43_vm1, %v374_v11, %v373_v18  ;;  %v382_v24 = vrot.slane %v363_v19, 5 }
  0x42   :  { %v390_v25 = vld [vmem:[#allocation2 + $0x1b] sm:$0x1]  ;;  %v391_v26 = vld [vmem:[#allocation2 + $0x2b] sm:$0x1]  ;;  %v377_v27 = vsel %vm46_vm2, %v376_v14, %v375_v23  ;;  %v379_v28 = vsel %vm40_vm0, %v378_v20, %v360_v12  ;;  %v422_v42 = vld [vmem:[#allocation2 + $0xc] sm:$0x1] }
  0x43   :  { %v392_v29 = vld [vmem:[#allocation2 + $0x3b] sm:$0x1]  ;;  %v405_v30 = vrot.slane %v390_v25, 7  ;;  %v407_v31 = vrot.slane %v391_v26, 6  ;;  %v393_v32 = vld [vmem:[#allocation2 + $0x4b] sm:$0x1]  ;;  %v381_v33 = vsel %vm43_vm1, %v380_v21, %v379_v28 }
  0x44   :  { %387 = vst.msk [vmem:[#allocation5 + $0x28] sm:$0xf] %vm56_vm3, %v377_v27  ;;  %v409_v34 = vrot.slane %v392_v29, 5  ;;  %v394_v35 = vld [vmem:[#allocation2 + $0x5b] sm:$0x1]  ;;  %v383_v37 = vsel %vm46_vm2, %v382_v24, %v381_v33 }
  0x45   :  { %v395_v36 = vld [vmem:[#allocation2 + $0x6b] sm:$0x1]  ;;  %v406_v38 = vsel %vm40_vm0, %v405_v30, %v389_v22  ;;  %v396_v39 = vld [vmem:[#allocation2 + $0x7b] sm:$0x1]  ;;  %v411_v40 = vrot.slane %v394_v35, 7 }
  0x46   :  { %v413_v41 = vrot.slane %v395_v36, 6  ;;  %388 = vst.msk [vmem:[#allocation5 + $0x68] sm:$0xf] %vm56_vm3, %v383_v37  ;;  %v408_v43 = vsel %vm43_vm1, %v407_v31, %v406_v38  ;;  %v415_v44 = vrot.slane %v396_v39, 5  ;;  %v423_v45 = vld [vmem:[#allocation2 + $0x1c] sm:$0x1] }
  0x47   :  { %v424_v46 = vld [vmem:[#allocation2 + $0x2c] sm:$0x1]  ;;  %v410_v47 = vsel %vm46_vm2, %v409_v34, %v408_v43  ;;  %v412_v48 = vsel %vm40_vm0, %v411_v40, %v393_v32  ;;  %v425_v49 = vld [vmem:[#allocation2 + $0x3c] sm:$0x1]  ;;  %v438_v50 = vrot.slane %v423_v45, 7 }
  0x48   :  { %v440_v51 = vrot.slane %v424_v46, 6  ;;  %v426_v52 = vld [vmem:[#allocation2 + $0x4c] sm:$0x1]  ;;  %420 = vst.msk [vmem:[#allocation5 + $0x2c] sm:$0xf] %vm56_vm3, %v410_v47  ;;  %v414_v53 = vsel %vm43_vm1, %v413_v41, %v412_v48  ;;  %v442_v54 = vrot.slane %v425_v49, 5 }
  0x49   :  { %v427_v55 = vld [vmem:[#allocation2 + $0x5c] sm:$0x1]  ;;  %v428_v56 = vld [vmem:[#allocation2 + $0x6c] sm:$0x1]  ;;  %v416_v57 = vsel %vm46_vm2, %v415_v44, %v414_v53  ;;  %v439_v58 = vsel %vm40_vm0, %v438_v50, %v422_v42  ;;  %v455_v62 = vld [vmem:[#allocation2 + $0xd] sm:$0x1] }
  0x4a   :  { %v429_v59 = vld [vmem:[#allocation2 + $0x7c] sm:$0x1]  ;;  %v444_v60 = vrot.slane %v427_v55, 7  ;;  %v446_v61 = vrot.slane %v428_v56, 6  ;;  %421 = vst.msk [vmem:[#allocation5 + $0x6c] sm:$0xf] %vm56_vm3, %v416_v57  ;;  %v441_v63 = vsel %vm43_vm1, %v440_v51, %v439_v58 }
  0x4b   :  { %v448_v0 = vrot.slane %v429_v59, 5  ;;  %v456_v1 = vld [vmem:[#allocation2 + $0x1d] sm:$0x1]  ;;  %v457_v2 = vld [vmem:[#allocation2 + $0x2d] sm:$0x1]  ;;  %v443_v3 = vsel %vm46_vm2, %v442_v54, %v441_v63 }
  0x4c   :  { %v445_v4 = vsel %vm40_vm0, %v444_v60, %v426_v52  ;;  %v458_v5 = vld [vmem:[#allocation2 + $0x3d] sm:$0x1]  ;;  %v471_v6 = vrot.slane %v456_v1, 7  ;;  %v473_v7 = vrot.slane %v457_v2, 6  ;;  %v459_v8 = vld [vmem:[#allocation2 + $0x4d] sm:$0x1] }
  0x4d   :  { %453 = vst.msk [vmem:[#allocation5 + $0x30] sm:$0xf] %vm56_vm3, %v443_v3  ;;  %v447_v9 = vsel %vm43_vm1, %v446_v61, %v445_v4  ;;  %v475_v10 = vrot.slane %v458_v5, 5  ;;  %v460_v11 = vld [vmem:[#allocation2 + $0x5d] sm:$0x1] }
  0x4e   :  { %v461_v12 = vld [vmem:[#allocation2 + $0x6d] sm:$0x1]  ;;  %v449_v13 = vsel %vm46_vm2, %v448_v0, %v447_v9  ;;  %v472_v14 = vsel %vm40_vm0, %v471_v6, %v455_v62  ;;  %v462_v15 = vld [vmem:[#allocation2 + $0x7d] sm:$0x1]  ;;  %v477_v16 = vrot.slane %v460_v11, 7 }
  0x4f   :  { %v479_v17 = vrot.slane %v461_v12, 6  ;;  %v488_v18 = vld [vmem:[#allocation2 + $0xe] sm:$0x1]  ;;  %454 = vst.msk [vmem:[#allocation5 + $0x70] sm:$0xf] %vm56_vm3, %v449_v13  ;;  %v474_v19 = vsel %vm43_vm1, %v473_v7, %v472_v14  ;;  %v481_v20 = vrot.slane %v462_v15, 5 }
  0x50   :  { %v489_v21 = vld [vmem:[#allocation2 + $0x1e] sm:$0x1]  ;;  %v490_v22 = vld [vmem:[#allocation2 + $0x2e] sm:$0x1]  ;;  %v476_v23 = vsel %vm46_vm2, %v475_v10, %v474_v19  ;;  %v478_v24 = vsel %vm40_vm0, %v477_v16, %v459_v8  ;;  %v521_v38 = vld [vmem:[#allocation2 + $0xf] sm:$0x1] }
  0x51   :  { %v491_v25 = vld [vmem:[#allocation2 + $0x3e] sm:$0x1]  ;;  %v504_v26 = vrot.slane %v489_v21, 7  ;;  %v506_v27 = vrot.slane %v490_v22, 6  ;;  %v492_v28 = vld [vmem:[#allocation2 + $0x4e] sm:$0x1]  ;;  %v480_v29 = vsel %vm43_vm1, %v479_v17, %v478_v24 }
  0x52   :  { %486 = vst.msk [vmem:[#allocation5 + $0x34] sm:$0xf] %vm56_vm3, %v476_v23  ;;  %v508_v30 = vrot.slane %v491_v25, 5  ;;  %v493_v31 = vld [vmem:[#allocation2 + $0x5e] sm:$0x1]  ;;  %v482_v33 = vsel %vm46_vm2, %v481_v20, %v480_v29 }
  0x53   :  { %v494_v32 = vld [vmem:[#allocation2 + $0x6e] sm:$0x1]  ;;  %v505_v34 = vsel %vm40_vm0, %v504_v26, %v488_v18  ;;  %v495_v35 = vld [vmem:[#allocation2 + $0x7e] sm:$0x1]  ;;  %v510_v36 = vrot.slane %v493_v31, 7 }
  0x54   :  { %v512_v37 = vrot.slane %v494_v32, 6  ;;  %487 = vst.msk [vmem:[#allocation5 + $0x74] sm:$0xf] %vm56_vm3, %v482_v33  ;;  %v507_v39 = vsel %vm43_vm1, %v506_v27, %v505_v34  ;;  %v514_v40 = vrot.slane %v495_v35, 5  ;;  %v522_v41 = vld [vmem:[#allocation2 + $0x1f] sm:$0x1] }
  0x55   :  { %v523_v42 = vld [vmem:[#allocation2 + $0x2f] sm:$0x1]  ;;  %v509_v43 = vsel %vm46_vm2, %v508_v30, %v507_v39  ;;  %v511_v44 = vsel %vm40_vm0, %v510_v36, %v492_v28  ;;  %v524_v45 = vld [vmem:[#allocation2 + $0x3f] sm:$0x1]  ;;  %v537_v46 = vrot.slane %v522_v41, 7 }
  0x56   :  { %v539_v47 = vrot.slane %v523_v42, 6  ;;  %v525_v48 = vld [vmem:[#allocation2 + $0x4f] sm:$0x1]  ;;  %519 = vst.msk [vmem:[#allocation5 + $0x38] sm:$0xf] %vm56_vm3, %v509_v43  ;;  %v513_v49 = vsel %vm43_vm1, %v512_v37, %v511_v44  ;;  %v541_v50 = vrot.slane %v524_v45, 5 }
  0x57   :  { %v526_v51 = vld [vmem:[#allocation2 + $0x5f] sm:$0x1]  ;;  %v527_v52 = vld [vmem:[#allocation2 + $0x6f] sm:$0x1]  ;;  %v515_v53 = vsel %vm46_vm2, %v514_v40, %v513_v49  ;;  %v538_v54 = vsel %vm40_vm0, %v537_v46, %v521_v38 }
  0x58   :  { %v528_v55 = vld [vmem:[#allocation2 + $0x7f] sm:$0x1]  ;;  %v543_v56 = vrot.slane %v526_v51, 7  ;;  %v545_v57 = vrot.slane %v527_v52, 6  ;;  %520 = vst.msk [vmem:[#allocation5 + $0x78] sm:$0xf] %vm56_vm3, %v515_v53  ;;  %v540_v58 = vsel %vm43_vm1, %v539_v47, %v538_v54 }
  0x59   :  { %v547_v59 = vrot.slane %v528_v55, 5  ;;  %v542_v60 = vsel %vm46_vm2, %v541_v50, %v540_v58 }
  0x5a   :  { %v544_v61 = vsel %vm40_vm0, %v543_v56, %v525_v48  ;;  %552 = vst.msk [vmem:[#allocation5 + $0x3c] sm:$0xf] %vm56_vm3, %v542_v60 }
  0x5b   :  { %v546_v62 = vsel %vm43_vm1, %v545_v57, %v544_v61 }
  0x5c   :  { %v548_v63 = vsel %vm46_vm2, %v547_v59, %v546_v62 }
  0x5d   :  { %553 = vst.msk [vmem:[#allocation5 + $0x7c] sm:$0xf] %vm56_vm3, %v548_v63 }
  0x5e   :  { %608 = shalt.err (!%p605_p9)
}
  0x5f   :  { %s625_s15 = smov 64   ;;  %s626_s16 = smov 4  }
  0x60   :  { %565 = dma.vmem_to_hbm [thread:$0]  %s560_s13, 2048, %s772_s1, [#allocation4], %s625_s15, %s625_s15, %s626_s16  }
  0x61   :  { %619 = dma.done.wait [#allocation4], 2048  }
  0x62   :  { %620 = vsyncadd [#allocation4], 4294965248 }
  0x63   :  { %569 = vsyncpa [#allocation3], 1 }
  0x64   :  { %570 = vsyncpa [#allocation4], 1 }

</bundles_post_ra>
